<compile_context>
chip_gen: v7x
topology: tpu7x:2x2x1
jax: 0.10.0
libtpu: 0.0.40
codegen_flags: <defaults>
</compile_context>

<pallas_src>
import numpy as np
import jax
import jax.numpy as jnp
from jax.experimental import pallas as pl
from jax.experimental.pallas import tpu as pltpu

# ----------------------------------------------------------------------------
# db4 analysis filters (pywt convention), fixed deterministic coefficients.
# ----------------------------------------------------------------------------
DB4_DEC_LO = np.array(
    [-0.010597401784997278, 0.032883011666982945, 0.030841381835986965,
     -0.18703481171888114, -0.02798376941698385, 0.6308807679295904,
     0.7148465705525415, 0.23037781330885523],
    dtype=np.float64,
)
_L = len(DB4_DEC_LO)
# Quadrature mirror: hi[k] = (-1)^(k+1) * lo[L-1-k]  (matches pywt db4 dec_hi)
# TODO(synk): convention only validated against the in-script NumPy reference,
# not against pywt itself (detail bands could differ by a sign).
DB4_DEC_HI = np.array(
    [((-1.0) ** (k + 1)) * DB4_DEC_LO[_L - 1 - k] for k in range(_L)],
    dtype=np.float64,
)

_BF16_SPATIAL_THRESHOLD = 512     # cast a level's matmuls to bf16 above this
_BUFFER1_SPATIAL_THRESHOLD = 256  # single-buffer filter blocks above this


def _analysis_matrix(n, filt):
    """(n//2, n) matrix A with (A @ x)[k] = sum_m filt[m] * x[(2k+m) % n]."""
    n2 = n // 2
    A = np.zeros((n2, n), dtype=np.float32)
    for k in range(n2):
        for m in range(_L):
            A[k, (2 * k + m) % n] += filt[m]
    return A


def _packed_matrices(h, w):
    """Fused lo|hi analysis matrices for one level.

    A_both: (h, h) = [alo ; ahi] stacked on rows   (column / height pass)
    G_both: (w, w) = [glo | ghi] stacked on cols   (row / width pass)
    Quadrants of A_both @ x @ G_both:
      [: h/2, : w/2] = cA   [h/2 :, : w/2] = cH
      [: h/2, w/2 :] = cV   [h/2 :, w/2 :] = cD
    """
    a_both = np.concatenate(
        [_analysis_matrix(h, DB4_DEC_LO), _analysis_matrix(h, DB4_DEC_HI)],
        axis=0)
    g_both = np.concatenate(
        [_analysis_matrix(w, DB4_DEC_LO).T, _analysis_matrix(w, DB4_DEC_HI).T],
        axis=1)
    return a_both, g_both


def _choose_batch_tile(batch, height):
    """Images per grid step: fill the MXU M dim, keep >=2 steps for megacore."""
    target = max(1, 256 // max(height, 1))
    divisors = [d for d in range(1, batch + 1) if batch % d == 0]
    fitting = [d for d in divisors if d <= target]
    bt = max(fitting) if fitting else 1
    # v7x has 2 TensorCores; keep >= 2 parallel grid steps when that does not
    # starve the MXU M dimension (>=128 rows per step).
    if batch // bt < 2 and batch >= 2:
        half = max(d for d in divisors if d <= (batch + 1) // 2)
        if half * height >= 128:
            bt = half
    return bt


def _vmem_capacity_bytes():
    try:
        return int(pltpu.get_tpu_info().vmem_capacity_bytes)
    except Exception:  # pragma: no cover - conservative fallback (v7x per-TC)
        return 64 * 1024 * 1024


# ----------------------------------------------------------------------------
# Pallas kernel: ALL DWT levels for one batch-tile of Bt images.
# ----------------------------------------------------------------------------
def _make_fused_dwt_kernel(shapes, bt, dtypes):
    """refs: (x_ref, A_1..A_L, G_1..G_L, out_1..out_L); out_l quadrant-packed."""
    level = len(shapes)

    def kernel(*refs):
        x_ref = refs[0]
        a_refs = refs[1:1 + level]
        g_refs = refs[1 + level:1 + 2 * level]
        out_refs = refs[1 + 2 * level:1 + 3 * level]

        cur = x_ref[...]                                       # (bt, H, W) f32
        for l in range(level):
            h, w = shapes[l]
            dt = dtypes[l]
            g = g_refs[l][...]                                 # (w, w)
            a = a_refs[l][...]                                 # (h, h)
            x_l = cur.astype(dt)

            # Row / width pass.  When the per-image height is sublane-aligned
            # (or there is a single image) fold the batch into the MXU M dim:
            # one big rank-2 matmul instead of bt small ones.
            if h % 8 == 0 or bt == 1:
                r = jnp.dot(
                    x_l.reshape(bt * h, w), g,
                    preferred_element_type=jnp.float32).reshape(bt, h, w)
            else:
                g_b = jnp.broadcast_to(g, (bt, w, w))
                r = jnp.einsum('bij,bjk->bik', x_l, g_b,
                               preferred_element_type=jnp.float32)

            # Column / height pass: batched matmul with the broadcast A filter
            # (per-image M = h; batch handled by the batch dimension).
            a_b = jnp.broadcast_to(a, (bt, h, h))
            q = jnp.einsum('bij,bjk->bik', a_b, r.astype(dt),
                           preferred_element_type=jnp.float32)  # (bt, h, w)

            out_refs[l][...] = q          # one lane-dense store per level
            cur = q[:, :h // 2, :w // 2]  # cA feeds the next (coarser) level

    return kernel


def wavelet_decompose(x, level=3):
    """JAX/Pallas equivalent of WaveletDecompose(wave='db4', level=3).forward.

    x: (B, 1, H, W) NCHW float.  Returns the list of coefficient tensors
    [cA_L, cH_L, cV_L, cD_L, ..., cH_1, cV_1, cD_1], each (B, 1, h_l, w_l),
    float32 (pywt coeffs ordering, coarsest first).
    """
    B, C, H, W = x.shape
    assert C == 1, "reference module squeezes a single channel"
    a = x[:, 0, :, :].astype(jnp.float32)      # squeeze(1), like the reference

    # Per-level spatial sizes, dtypes and packed filter matrices.
    shapes, lvl_dtypes, a_mats, g_mats = [], [], [], []
    h, w = H, W
    for _ in range(level):
        assert h % 2 == 0 and w % 2 == 0, "H, W must be divisible by 2**level"
        shapes.append((h, w))
        dt = jnp.bfloat16 if max(h, w) >= _BF16_SPATIAL_THRESHOLD else jnp.float32
        lvl_dtypes.append(dt)
        a_np, g_np = _packed_matrices(h, w)
        a_mats.append(jnp.asarray(a_np, dtype=dt))   # (h, h)
        g_mats.append(jnp.asarray(g_np, dtype=dt))   # (w, w)
        h //= 2
        w //= 2

    bt = _choose_batch_tile(B, H)
    assert B % bt == 0
    grid = (B // bt,)

    out_shape = tuple(
        jax.ShapeDtypeStruct((B, hh, ww), jnp.float32) for hh, ww in shapes)

    # Constant-index filter blocks: single-buffer them for large images (their
    # index_map never changes, so double-buffering is pure VMEM waste there).
    filter_pm = (pl.Buffered(1)
                 if max(H, W) >= _BUFFER1_SPATIAL_THRESHOLD else None)

    def _const_spec(n):
        if filter_pm is None:
            return pl.BlockSpec((n, n), lambda i: (0, 0))
        return pl.BlockSpec((n, n), lambda i: (0, 0), pipeline_mode=filter_pm)

    in_specs = [pl.BlockSpec((bt, H, W), lambda i: (i, 0, 0))]
    for hh, _ww in shapes:
        in_specs.append(_const_spec(hh))
    for _hh, ww in shapes:
        in_specs.append(_const_spec(ww))
    out_specs = [pl.BlockSpec((bt, hh, ww), lambda i: (i, 0, 0))
                 for hh, ww in shapes]

    # VMEM budget per grid step (pipelined blocks + in-kernel temporaries).
    filt_bufs = 1 if filter_pm is not None else 2
    filt_bytes = {jnp.float32: 4, jnp.bfloat16: 2}
    est_vmem = (
        4 * 2 * bt * H * W                                       # input block
        + sum(filt_bufs * filt_bytes[dt] * (hh * hh + ww * ww)
              for (hh, ww), dt in zip(shapes, lvl_dtypes))       # filter blocks
        + 4 * 2 * sum(bt * hh * ww for hh, ww in shapes)         # output blocks
        + sum(4 * int(2.5 * bt * hh * ww) + 4 * bt * hh * hh
              for hh, ww in shapes)                              # r, q, cA, A_b
    )
    cp_kwargs = dict(dimension_semantics=("parallel",))
    if est_vmem > 12 * 1024 * 1024:
        cap = _vmem_capacity_bytes()
        # Leave headroom for Mosaic internal scratch / semaphores: never ask
        # for the full physical VMEM (esp. v7x's 64 MiB per TensorCore).
        cp_kwargs["vmem_limit_bytes"] = int(min(2 * est_vmem, int(0.8 * cap)))

    flops = int(sum(2 * B * hh * ww * (hh + ww) for hh, ww in shapes))
    bytes_accessed = int(
        4 * B * H * W
        + sum(filt_bytes[dt] * (hh * hh + ww * ww)
              for (hh, ww), dt in zip(shapes, lvl_dtypes))
        + 4 * sum(B * hh * ww for hh, ww in shapes))
    cost = pl.CostEstimate(flops=flops, transcendentals=0,
                           bytes_accessed=bytes_accessed)

    outs = pl.pallas_call(
        _make_fused_dwt_kernel(tuple(shapes), bt, tuple(lvl_dtypes)),
        out_shape=out_shape,
        grid=grid,
        in_specs=in_specs,
        out_specs=out_specs,
        compiler_params=pltpu.CompilerParams(**cp_kwargs),
        cost_estimate=cost,
    )(a, *a_mats, *g_mats)

    # Split the quadrant-packed per-level maps into subbands (plain jnp slices).
    details = []
    ca = None
    for l, ((hh, ww), q) in enumerate(zip(shapes, outs)):
        h2, w2 = hh // 2, ww // 2
        if l == level - 1:
            ca = q[:, :h2, :w2]                                   # cA_L
        details.append((q[:, h2:, :w2],                           # cH_l
                        q[:, :h2, w2:],                           # cV_l
                        q[:, h2:, w2:]))                          # cD_l

    tensors = [ca[:, None]]                 # unsqueeze(1) on the approximation
    for lh, hl, hh_ in reversed(details):   # pywt order: coarsest -> finest
        tensors += [lh[:, None], hl[:, None], hh_[:, None]]
    return tensors


if __name__ == "__main__":
    key = jax.random.PRNGKey(0)
    B, H, W = 2, 16, 16
    x = jax.random.normal(key, (B, 1, H, W), dtype=jnp.float32)

    coeffs = wavelet_decompose(x, level=3)
    coeffs = [jax.block_until_ready(c) for c in coeffs]

    # Sanity: 1 approx + 3*3 detail maps, expected spatial pyramid 2/4/8.
    assert len(coeffs) == 10
    assert coeffs[0].shape == (B, 1, 2, 2)           # cA3
    assert coeffs[1].shape == (B, 1, 2, 2)           # level-3 details
    assert coeffs[4].shape == (B, 1, 4, 4)           # level-2 details
    assert coeffs[7].shape == (B, 1, 8, 8)           # level-1 details
    assert all(c.dtype == jnp.float32 for c in coeffs)
    assert all(bool(jnp.isfinite(c).all()) for c in coeffs)

    # Numerical cross-check of the fused, batch-folded kernel against a plain
    # NumPy implementation of the same circular-DWT math.
    x_np = np.asarray(x[:, 0], dtype=np.float32)
    a_cur = x_np
    det_ref = []
    for _ in range(3):
        hh, ww = a_cur.shape[1], a_cur.shape[2]
        Al = _analysis_matrix(hh, DB4_DEC_LO)
        Ah = _analysis_matrix(hh, DB4_DEC_HI)
        Gl = _analysis_matrix(ww, DB4_DEC_LO).T
        Gh = _analysis_matrix(ww, DB4_DEC_HI).T
        rl = a_cur @ Gl
        rh = a_cur @ Gh
        ll = np.einsum('ij,bjk->bik', Al, rl)
        lh = np.einsum('ij,bjk->bik', Ah, rl)
        hl = np.einsum('ij,bjk->bik', Al, rh)
        dd = np.einsum('ij,bjk->bik', Ah, rh)
        det_ref.append((lh, hl, dd))
        a_cur = ll
    ref_list = [a_cur[:, None]]
    for lh, hl, dd in reversed(det_ref):
        ref_list += [lh[:, None], hl[:, None], dd[:, None]]
    for got, exp in zip(coeffs, ref_list):
        assert np.allclose(np.asarray(got), exp, rtol=1e-4, atol=1e-4)

    print("KERNEL_OK")
</pallas_src>

<mosaic_0001>
module attributes {stable_mosaic.version = 11 : i64} {
  func.func @kernel(%arg0: i32, %arg1: memref<2x16x16xf32, #tpu.memory_space<vmem>>, %arg2: memref<16x16xf32, #tpu.memory_space<vmem>>, %arg3: memref<8x8xf32, #tpu.memory_space<vmem>>, %arg4: memref<4x4xf32, #tpu.memory_space<vmem>>, %arg5: memref<16x16xf32, #tpu.memory_space<vmem>>, %arg6: memref<8x8xf32, #tpu.memory_space<vmem>>, %arg7: memref<4x4xf32, #tpu.memory_space<vmem>>, %arg8: memref<2x16x16xf32, #tpu.memory_space<vmem>>, %arg9: memref<2x8x8xf32, #tpu.memory_space<vmem>>, %arg10: memref<2x4x4xf32, #tpu.memory_space<vmem>>) attributes {dimension_semantics = [#tpu.dimension_semantics<parallel>], iteration_bounds = array<i64: 1>, scalar_prefetch = 0 : i64, scratch_operands = 0 : i64, tpu.core_type = #tpu.core_type<tc>, window_params = [{transform_indices = @transform_0, window_bounds = array<i64: 2, 16, 16>}, {pipeline_mode = #tpu.pipeline_mode<synchronous>, transform_indices = @transform_1, window_bounds = array<i64: 16, 16>}, {pipeline_mode = #tpu.pipeline_mode<synchronous>, transform_indices = @transform_2, window_bounds = array<i64: 8, 8>}, {pipeline_mode = #tpu.pipeline_mode<synchronous>, transform_indices = @transform_3, window_bounds = array<i64: 4, 4>}, {pipeline_mode = #tpu.pipeline_mode<synchronous>, transform_indices = @transform_4, window_bounds = array<i64: 16, 16>}, {pipeline_mode = #tpu.pipeline_mode<synchronous>, transform_indices = @transform_5, window_bounds = array<i64: 8, 8>}, {pipeline_mode = #tpu.pipeline_mode<synchronous>, transform_indices = @transform_6, window_bounds = array<i64: 4, 4>}, {transform_indices = @transform_7, window_bounds = array<i64: 2, 16, 16>}, {transform_indices = @transform_8, window_bounds = array<i64: 2, 8, 8>}, {transform_indices = @transform_9, window_bounds = array<i64: 2, 4, 4>}]} {
    %c0 = arith.constant 0 : index
    %c0_0 = arith.constant 0 : index
    %c0_1 = arith.constant 0 : index
    %0 = vector.load %arg1[%c0, %c0_0, %c0_1] : memref<2x16x16xf32, #tpu.memory_space<vmem>>, vector<2x16x16xf32>
    %c0_2 = arith.constant 0 : index
    %c0_3 = arith.constant 0 : index
    %1 = vector.load %arg5[%c0_2, %c0_3] : memref<16x16xf32, #tpu.memory_space<vmem>>, vector<16x16xf32>
    %c0_4 = arith.constant 0 : index
    %c0_5 = arith.constant 0 : index
    %2 = vector.load %arg2[%c0_4, %c0_5] : memref<16x16xf32, #tpu.memory_space<vmem>>, vector<16x16xf32>
    %3 = vector.shape_cast %0 : vector<2x16x16xf32> to vector<32x16xf32>
    %cst = arith.constant dense<0.000000e+00> : vector<32x16xf32>
    %4 = tpu.matmul %3, %1, %cst {dimension_numbers = #tpu.dot_dimension_numbers<[1], [0], [0], [1], [0, 0, 1, 1], [], []>} : vector<32x16xf32>, vector<16x16xf32>, vector<32x16xf32> -> vector<32x16xf32>
    %5 = vector.shape_cast %4 : vector<32x16xf32> to vector<2x16x16xf32>
    %6 = vector.shape_cast %2 : vector<16x16xf32> to vector<1x16x16xf32>
    %7 = vector.broadcast %6 : vector<1x16x16xf32> to vector<2x16x16xf32>
    "tpu.trace_start"() <{level = 10 : i32, message = "bij,bjk->bik"}> : () -> ()
    %cst_6 = arith.constant dense<0.000000e+00> : vector<2x16x16xf32>
    %8 = tpu.matmul %7, %5, %cst_6 {dimension_numbers = #tpu.dot_dimension_numbers<[2], [1], [1], [2], [0, 0, 0, 1, 1, 2], [0], [0]>} : vector<2x16x16xf32>, vector<2x16x16xf32>, vector<2x16x16xf32> -> vector<2x16x16xf32>
    "tpu.trace_stop"() : () -> ()
    %c0_7 = arith.constant 0 : index
    %c0_8 = arith.constant 0 : index
    %c0_9 = arith.constant 0 : index
    %9 = vector.load %arg8[%c0_7, %c0_8, %c0_9] : memref<2x16x16xf32, #tpu.memory_space<vmem>>, vector<2x16x16xf32>
    tpu.vector_store %arg8[%c0_7, %c0_8, %c0_9], %8 {strides = array<i32>} : memref<2x16x16xf32, #tpu.memory_space<vmem>>, vector<2x16x16xf32>,
    %10 = vector.extract_strided_slice %8 {offsets = [0, 0, 0], sizes = [2, 8, 8], strides = [1, 1, 1]} : vector<2x16x16xf32> to vector<2x8x8xf32>
    %c0_10 = arith.constant 0 : index
    %c0_11 = arith.constant 0 : index
    %11 = vector.load %arg6[%c0_10, %c0_11] : memref<8x8xf32, #tpu.memory_space<vmem>>, vector<8x8xf32>
    %c0_12 = arith.constant 0 : index
    %c0_13 = arith.constant 0 : index
    %12 = vector.load %arg3[%c0_12, %c0_13] : memref<8x8xf32, #tpu.memory_space<vmem>>, vector<8x8xf32>
    %13 = vector.shape_cast %10 : vector<2x8x8xf32> to vector<16x8xf32>
    %cst_14 = arith.constant dense<0.000000e+00> : vector<16x8xf32>
    %14 = tpu.matmul %13, %11, %cst_14 {dimension_numbers = #tpu.dot_dimension_numbers<[1], [0], [0], [1], [0, 0, 1, 1], [], []>} : vector<16x8xf32>, vector<8x8xf32>, vector<16x8xf32> -> vector<16x8xf32>
    %15 = vector.shape_cast %14 : vector<16x8xf32> to vector<2x8x8xf32>
    %16 = vector.shape_cast %12 : vector<8x8xf32> to vector<1x8x8xf32>
    %17 = vector.broadcast %16 : vector<1x8x8xf32> to vector<2x8x8xf32>
    "tpu.trace_start"() <{level = 10 : i32, message = "bij,bjk->bik"}> : () -> ()
    %cst_15 = arith.constant dense<0.000000e+00> : vector<2x8x8xf32>
    %18 = tpu.matmul %17, %15, %cst_15 {dimension_numbers = #tpu.dot_dimension_numbers<[2], [1], [1], [2], [0, 0, 0, 1, 1, 2], [0], [0]>} : vector<2x8x8xf32>, vector<2x8x8xf32>, vector<2x8x8xf32> -> vector<2x8x8xf32>
    "tpu.trace_stop"() : () -> ()
    %c0_16 = arith.constant 0 : index
    %c0_17 = arith.constant 0 : index
    %c0_18 = arith.constant 0 : index
    %19 = vector.load %arg9[%c0_16, %c0_17, %c0_18] : memref<2x8x8xf32, #tpu.memory_space<vmem>>, vector<2x8x8xf32>
    tpu.vector_store %arg9[%c0_16, %c0_17, %c0_18], %18 {strides = array<i32>} : memref<2x8x8xf32, #tpu.memory_space<vmem>>, vector<2x8x8xf32>,
    %20 = vector.extract_strided_slice %18 {offsets = [0, 0, 0], sizes = [2, 4, 4], strides = [1, 1, 1]} : vector<2x8x8xf32> to vector<2x4x4xf32>
    %c0_19 = arith.constant 0 : index
    %c0_20 = arith.constant 0 : index
    %21 = vector.load %arg7[%c0_19, %c0_20] : memref<4x4xf32, #tpu.memory_space<vmem>>, vector<4x4xf32>
    %c0_21 = arith.constant 0 : index
    %c0_22 = arith.constant 0 : index
    %22 = vector.load %arg4[%c0_21, %c0_22] : memref<4x4xf32, #tpu.memory_space<vmem>>, vector<4x4xf32>
    %23 = vector.shape_cast %21 : vector<4x4xf32> to vector<1x4x4xf32>
    %24 = vector.broadcast %23 : vector<1x4x4xf32> to vector<2x4x4xf32>
    "tpu.trace_start"() <{level = 10 : i32, message = "bij,bjk->bik"}> : () -> ()
    %cst_23 = arith.constant dense<0.000000e+00> : vector<2x4x4xf32>
    %25 = tpu.matmul %20, %24, %cst_23 {dimension_numbers = #tpu.dot_dimension_numbers<[2], [1], [1], [2], [0, 0, 0, 1, 1, 2], [0], [0]>} : vector<2x4x4xf32>, vector<2x4x4xf32>, vector<2x4x4xf32> -> vector<2x4x4xf32>
    "tpu.trace_stop"() : () -> ()
    %26 = vector.shape_cast %22 : vector<4x4xf32> to vector<1x4x4xf32>
    %27 = vector.broadcast %26 : vector<1x4x4xf32> to vector<2x4x4xf32>
    "tpu.trace_start"() <{level = 10 : i32, message = "bij,bjk->bik"}> : () -> ()
    %cst_24 = arith.constant dense<0.000000e+00> : vector<2x4x4xf32>
    %28 = tpu.matmul %27, %25, %cst_24 {dimension_numbers = #tpu.dot_dimension_numbers<[2], [1], [1], [2], [0, 0, 0, 1, 1, 2], [0], [0]>} : vector<2x4x4xf32>, vector<2x4x4xf32>, vector<2x4x4xf32> -> vector<2x4x4xf32>
    "tpu.trace_stop"() : () -> ()
    %c0_25 = arith.constant 0 : index
    %c0_26 = arith.constant 0 : index
    %c0_27 = arith.constant 0 : index
    %29 = vector.load %arg10[%c0_25, %c0_26, %c0_27] : memref<2x4x4xf32, #tpu.memory_space<vmem>>, vector<2x4x4xf32>
    tpu.vector_store %arg10[%c0_25, %c0_26, %c0_27], %28 {strides = array<i32>} : memref<2x4x4xf32, #tpu.memory_space<vmem>>, vector<2x4x4xf32>,
    return
  }
  func.func @transform_0(%arg0: i32) -> (i32, i32, i32) {
    %c0_i32 = arith.constant 0 : i32
    %c0_i32_0 = arith.constant 0 : i32
    %c0_i32_1 = arith.constant 0 : i32
    return %arg0, %c0_i32, %c0_i32_0 : i32, i32, i32
  }
  func.func @transform_1(%arg0: i32) -> (i32, i32) {
    %c0_i32 = arith.constant 0 : i32
    %c0_i32_0 = arith.constant 0 : i32
    %c0_i32_1 = arith.constant 0 : i32
    return %c0_i32, %c0_i32_0 : i32, i32
  }
  func.func @transform_2(%arg0: i32) -> (i32, i32) {
    %c0_i32 = arith.constant 0 : i32
    %c0_i32_0 = arith.constant 0 : i32
    %c0_i32_1 = arith.constant 0 : i32
    return %c0_i32, %c0_i32_0 : i32, i32
  }
  func.func @transform_3(%arg0: i32) -> (i32, i32) {
    %c0_i32 = arith.constant 0 : i32
    %c0_i32_0 = arith.constant 0 : i32
    %c0_i32_1 = arith.constant 0 : i32
    return %c0_i32, %c0_i32_0 : i32, i32
  }
  func.func @transform_4(%arg0: i32) -> (i32, i32) {
    %c0_i32 = arith.constant 0 : i32
    %c0_i32_0 = arith.constant 0 : i32
    %c0_i32_1 = arith.constant 0 : i32
    return %c0_i32, %c0_i32_0 : i32, i32
  }
  func.func @transform_5(%arg0: i32) -> (i32, i32) {
    %c0_i32 = arith.constant 0 : i32
    %c0_i32_0 = arith.constant 0 : i32
    %c0_i32_1 = arith.constant 0 : i32
    return %c0_i32, %c0_i32_0 : i32, i32
  }
  func.func @transform_6(%arg0: i32) -> (i32, i32) {
    %c0_i32 = arith.constant 0 : i32
    %c0_i32_0 = arith.constant 0 : i32
    %c0_i32_1 = arith.constant 0 : i32
    return %c0_i32, %c0_i32_0 : i32, i32
  }
  func.func @transform_7(%arg0: i32) -> (i32, i32, i32) {
    %c0_i32 = arith.constant 0 : i32
    %c0_i32_0 = arith.constant 0 : i32
    %c0_i32_1 = arith.constant 0 : i32
    return %arg0, %c0_i32, %c0_i32_0 : i32, i32, i32
  }
  func.func @transform_8(%arg0: i32) -> (i32, i32, i32) {
    %c0_i32 = arith.constant 0 : i32
    %c0_i32_0 = arith.constant 0 : i32
    %c0_i32_1 = arith.constant 0 : i32
    return %arg0, %c0_i32, %c0_i32_0 : i32, i32, i32
  }
  func.func @transform_9(%arg0: i32) -> (i32, i32, i32) {
    %c0_i32 = arith.constant 0 : i32
    %c0_i32_0 = arith.constant 0 : i32
    %c0_i32_1 = arith.constant 0 : i32
    return %arg0, %c0_i32, %c0_i32_0 : i32, i32, i32
  }
}

</mosaic_0001>

<bundles_post_ra>
// kernel: tpu_custom_call.1
= control target key start
LH: loop header
LB: loop body
LE: loop exit
PB: predicated region body
PF: predicated region fallthrough
CT: control target
= control target key end

     0   :  { %15 = vsyncpa [#allocation3], 0  ;;  %s1448_s0 = inlined_call_operand.hbm [shape: f32[2,16,16], index: 0, kind: input, shape index: {}]   ;;  %s1449_s1 = inlined_call_operand.hbm [shape: f32[16,16], index: 1, kind: input, shape index: {}]   ;;  %s1450_s2 = inlined_call_operand.hbm [shape: f32[8,8], index: 2, kind: input, shape index: {}]   ;;  %s1451_s3 = inlined_call_operand.vmem [shape: f32[4,4], index: 3, kind: input, shape index: {}]   ;;  %s1452_s4 = inlined_call_operand.hbm [shape: f32[16,16], index: 4, kind: input, shape index: {}]   ;;  %s1453_s5 = inlined_call_operand.vmem [shape: f32[8,8], index: 5, kind: input, shape index: {}]   ;;  %s1454_s6 = inlined_call_operand.vmem [shape: f32[4,4], index: 6, kind: input, shape index: {}]   ;;  %s1455_s7 = inlined_call_operand.hbm [shape: f32[2,16,16], index: 7, kind: output, shape index: {0}]   ;;  %s1456_s8 = inlined_call_operand.hbm [shape: f32[2,8,8], index: 8, kind: output, shape index: {1}]   ;;  %s1457_s9 = inlined_call_operand.hbm [shape: f32[2,4,4], index: 9, kind: output, shape index: {2}]  }
   0x1   :  { %16 = vsyncpa [#allocation6], 0 }
   0x2   :  { %17 = vsyncpa [#allocation9], 0 }
   0x3   :  { %18 = vsyncpa [#allocation4], 0 }
   0x4   :  { %19 = vsyncpa [#allocation12], 0  ;;  %s1231_s30 = smov [#allocation5]   ;;  %s1232_s11 = smov [#allocation2]  }
   0x5   :  { %s37_s10 = sshll.u32 %s1231_s30, 4  ;;  %s25_s12 = sshll.u32 %s1232_s11, 4  ;;  %s38_s10 = int_to_ptr.vmem [resolvable:$true] %s37_s10  ;;  %s1294_s12 = int_to_ptr.vmem [resolvable:$true] %s25_s12 }
   0x6   :  { %s1067_s15 = scalar_lea.hbm %s1449_s1, 256 }
   0x7   :  { %p1068_p0 = scmp.ne.s32.totalorder %s1449_s1, %s1067_s15  ;;  %p1071_p1 = scmp.lt.u32.totalorder %s1067_s15, %s1449_s1 }
   0x9   :  { %p1073_p2 = pnand %p1071_p1, %p1068_p0 }
   0xb   :  { %1076 = shalt.err (!%p1073_p2)
}
   0xc   :  { %s1077_s20 = scalar_lea.vmem %s38_s10, 256  ;;  %p1082_p4 = scmp.lt.s32.totalorder %s38_s10, %s38_s10 }
   0xd   :  { %p1078_p3 = scmp.ne.s32.totalorder %s38_s10, %s1077_s20  ;;  %p1083_p5 = scmp.lt.s32.totalorder %s1077_s20, %s1077_s20 }
   0xf   :  { %p1084_p6 = por %p1083_p5, %p1082_p4 }
  0x11   :  { %p1085_p7 = pnand %p1084_p6, %p1078_p3 }
  0x13   :  { %1088 = shalt.err (!%p1085_p7)
}
  0x14   :  { %s1233_s21 = smov 128   ;;  %s1234_s22 = smov 8  }
  0x15   :  { %43 = dma.hbm_to_vmem [thread:$0]  %s1449_s1, 256, %s38_s10, [#allocation6], %s1233_s21, %s1233_s21, %s1234_s22  }
  0x16   :  { %s1089_s27 = scalar_lea.hbm %s1448_s0, 512 }
  0x17   :  { %p1090_p8 = scmp.ne.s32.totalorder %s1448_s0, %s1089_s27  ;;  %p1093_p9 = scmp.lt.u32.totalorder %s1089_s27, %s1448_s0 }
  0x19   :  { %p1095_p10 = pnand %p1093_p9, %p1090_p8 }
  0x1b   :  { %1098 = shalt.err (!%p1095_p10)
}
  0x1c   :  { %s1099_s13 = scalar_lea.vmem %s1294_s12, 512  ;;  %p1104_p12 = scmp.lt.s32.totalorder %s1294_s12, %s1294_s12 }
  0x1d   :  { %p1100_p11 = scmp.ne.s32.totalorder %s1294_s12, %s1099_s13  ;;  %p1105_p13 = scmp.lt.s32.totalorder %s1099_s13, %s1099_s13 }
  0x1f   :  { %p1106_p0 = por %p1105_p13, %p1104_p12 }
  0x21   :  { %p1107_p1 = pnand %p1106_p0, %p1100_p11 }
  0x23   :  { %1110 = shalt.err (!%p1107_p1)
}
  0x24   :  { %31 = dma.hbm_to_vmem [thread:$0]  %s1448_s0, 512, %s1294_s12, [#allocation3], %s1233_s21, %s1233_s21, %s1234_s22  }
  0x25   :  { %s1235_s14 = smov [#allocation7]   ;;  %s1236_s16 = smov [#allocation8]  }
  0x26   :  { %s50_s15 = sshll.u32 %s1235_s14, 4  ;;  %s61_s17 = sshll.u32 %s1236_s16, 4  ;;  %s51_s15 = int_to_ptr.vmem [resolvable:$true] %s50_s15  ;;  %s1331_s17 = int_to_ptr.vmem [resolvable:$true] %s61_s17 }
  0x27   :  { %s1111_s20 = scalar_lea.hbm %s1450_s2, 128 }
  0x28   :  { %p1112_p2 = scmp.ne.s32.totalorder %s1450_s2, %s1111_s20  ;;  %p1115_p3 = scmp.lt.u32.totalorder %s1111_s20, %s1450_s2 }
  0x2a   :  { %p1117_p4 = pnand %p1115_p3, %p1112_p2 }
  0x2c   :  { %1120 = shalt.err (!%p1117_p4)
}
  0x2d   :  { %s1121_s0 = scalar_lea.vmem %s51_s15, 128  ;;  %p1126_p6 = scmp.lt.s32.totalorder %s51_s15, %s51_s15 }
  0x2e   :  { %p1122_p5 = scmp.ne.s32.totalorder %s51_s15, %s1121_s0  ;;  %p1127_p7 = scmp.lt.s32.totalorder %s1121_s0, %s1121_s0 }
  0x30   :  { %p1128_p8 = por %p1127_p7, %p1126_p6 }
  0x32   :  { %p1129_p9 = pnand %p1128_p8, %p1122_p5 }
  0x34   :  { %1132 = shalt.err (!%p1129_p9)
}
  0x35   :  { %53 = dma.hbm_to_vmem [thread:$0]  %s1450_s2, 128, %s51_s15, [#allocation6]  }
  0x36   :  { %s1133_s30 = scalar_lea.hbm %s1452_s4, 256 }
  0x37   :  { %p1134_p10 = scmp.ne.s32.totalorder %s1452_s4, %s1133_s30  ;;  %p1137_p11 = scmp.lt.u32.totalorder %s1133_s30, %s1452_s4 }
  0x39   :  { %p1139_p12 = pnand %p1137_p11, %p1134_p10 }
  0x3b   :  { %1142 = shalt.err (!%p1139_p12)
}
  0x3c   :  { %s1143_s14 = scalar_lea.vmem %s1331_s17, 256  ;;  %p1148_p0 = scmp.lt.s32.totalorder %s1331_s17, %s1331_s17 }
  0x3d   :  { %p1144_p13 = scmp.ne.s32.totalorder %s1331_s17, %s1143_s14  ;;  %p1149_p1 = scmp.lt.s32.totalorder %s1143_s14, %s1143_s14 }
  0x3f   :  { %p1150_p2 = por %p1149_p1, %p1148_p0 }
  0x41   :  { %p1151_p3 = pnand %p1150_p2, %p1144_p13 }
  0x43   :  { %1154 = shalt.err (!%p1151_p3)
}
  0x44   :  { %67 = dma.hbm_to_vmem [thread:$0]  %s1452_s4, 256, %s1331_s17, [#allocation9], %s1233_s21, %s1233_s21, %s1234_s22  }
  0x45   :  { %1221 = dma.done.wait [#allocation3], 512  }
  0x46   :  { %1222 = vsyncadd [#allocation3], 4294966784 }
  0x47   :  { %1223 = dma.done.wait [#allocation6], 384  }
  0x48   :  { %1224 = vsyncadd [#allocation6], 4294966912 }
  0x49   :  { %1225 = dma.done.wait [#allocation9], 256  }
  0x4a   :  { %1226 = vsyncadd [#allocation9], 4294967040  ;;  %vm92_vm0 = vcmask 130048   ;;  %v88_v0 = vld [vmem:[#allocation8] sm:$0xff]  ;;  %v89_v1 = vld [vmem:[#allocation8 + $0x8] sm:$0xff]  ;;  %vm352_vm1 = vcmask 64512  }
  0x4b   :  { %v84_v2 = vld [vmem:[#allocation2] sm:$0xff]  ;;  %v1042_v3 = vpack.c.bf16 %v89_v1, %v88_v0  ;;  %v85_v4 = vld [vmem:[#allocation2 + $0x8] sm:$0xff]  ;;  %v86_v5 = vld [vmem:[#allocation2 + $0x10] sm:$0xff]  ;;  %v1237_v20 = vmov 0.0   ;;  %vm1238_vm2 = vmmov 0   ;;  %vm585_vm3 = vcmask 1043456  }
  0x4c   :  { %987 = vmatprep.mubr.msk.f32.mxu0 %vm92_vm0, %v84_v2  ;;  %v87_v6 = vld [vmem:[#allocation2 + $0x18] sm:$0xff]  ;;  %v90_v7 = vld [vmem:[#allocation5] sm:$0xff]  ;;  %v91_v13 = vld [vmem:[#allocation5 + $0x8] sm:$0xff]  ;;  %vm581_vm4 = vcmask 31744   ;;  %s1239_s19 = smov [#allocation11]   ;;  %s1240_s23 = smov [#allocation10]  }
  0x4d   :  { %1043 = vmatprep.subr.bf16.mxu0 %v1042_v3  ;;  %997 = vmatprep.mubr.msk.f32.mxu1 %vm92_vm0, %v90_v7  ;;  %v350_v15 = vld [vmem:[%s1453_s5] sm:$0xff]  ;;  %v351_v21 = vld [vmem:[#allocation7] sm:$0xff]  ;;  %s901_s20 = sshll.u32 %s1239_s19, 4  ;;  %s889_s24 = sshll.u32 %s1240_s23, 4  ;;  %s902_s20 = int_to_ptr.vmem [resolvable:$true] %s901_s20  ;;  %s890_s24 = int_to_ptr.vmem [resolvable:$true] %s889_s24 }
  0x4e   :  { %1045 = vmatpush3.bf16.msra.mxu0 %v1042_v3  ;;  %v579_v24 = vld [vmem:[%s1454_s6] sm:$0xf]  ;;  %s1155_s25 = scalar_lea.vmem %s902_s20, 256  ;;  %p1160_p5 = scmp.lt.s32.totalorder %s902_s20, %s902_s20 }
  0x4f   :  { %1007 = vmatprep.subr.mxu0 %v350_v15  ;;  %v580_v29 = vld [vmem:[%s1451_s3] sm:$0xf]  ;;  %p1156_p4 = scmp.ne.s32.totalorder %s902_s20, %s1155_s25  ;;  %p1161_p6 = scmp.lt.s32.totalorder %s1155_s25, %s1155_s25 }
  0x51   :  { %988 = vmatmul.mubr.msk.f32.vlgmr.msra.gmra.mrb[0].mxu0 %vm92_vm0, %v85_v4  ;;  %p1162_p7 = por %p1161_p6, %p1160_p5 }
  0x52   :  { %990 = vmatprep.mubr.msk.f32.mxu0 %vm92_vm0, %v86_v5  ;;  %1008 = vmatpush3.msra.mxu0 %v350_v15 }
  0x53   :  { %1017 = vmatprep.subr.mxu0 %v1237_v20  ;;  %p1163_p8 = pnand %p1162_p7, %p1156_p4 }
  0x55   :  { %991 = vmatmul.mubr.msk.f32.gmra.mrb[2].mxu0 %vm92_vm0, %v87_v6 }
 0x124   :  { %v989_v8 = vpop.f32.mrb[0].mxu0 }
 0x125   :  { %v171_v9 = vpop.f32.mrb[1].mxu0 }
 0x126   :  { %v1046_v10 = vpack.c.bf16 %v989_v8, %v171_v9 }
 0x128   :  { %v992_v11 = vpop.f32.mrb[2].mxu0  ;;  %1047 = vmatprep.subr.bf16.mxu1 %v1046_v10 }
 0x129   :  { %v181_v12 = vpop.f32.mrb[3].mxu0  ;;  %1049 = vmatpush3.bf16.msra.mxu1 %v1046_v10 }
 0x12a   :  { %v1050_v14 = vpack.c.bf16 %v992_v11, %v181_v12 }
 0x12c   :  { %998 = vmatmul.mubr.msk.f32.vlgmr.msra.gmra.mrb[0].mxu1 %vm92_vm0, %v91_v13  ;;  %1051 = vmatprep.subr.bf16.mxu1 %v1050_v14 }
 0x12d   :  { %1053 = vmatpush3.bf16.msra.mxu1 %v1050_v14  ;;  %1004 = vmatprep.mubr.msk.f32.mxu1 %vm92_vm0, %v90_v7 }
 0x12e   :  { %1012 = vmatprep.subr.mxu1 %v1237_v20 }
 0x130   :  { %1005 = vmatmul.mubr.msk.f32.vlgmr.msra.gmra.mrb[2].mxu1 %vm92_vm0, %v91_v13 }
 0x131   :  { %1014 = vmatprep.mubr.msk.f32.mxu1 %vm1238_vm2, %v1237_v20 }
 0x1ff   :  { %v999_v16 = vpop.f32.mrb[0].mxu1 }
 0x200   :  { %347 = vst.msk [vmem:[#allocation10 + $0x8] sm:$0xff] %vm92_vm0, %v999_v16  ;;  %v262_v17 = vpop.f32.mrb[1].mxu1 }
 0x201   :  { %346 = vst.msk [vmem:[#allocation10] sm:$0xff] %vm92_vm0, %v262_v17  ;;  %1009 = vmatprep.mubr.msk.f32.mxu0 %vm352_vm1, %v262_v17 }
 0x203   :  { %v1006_v18 = vpop.f32.mrb[2].mxu1 }
 0x204   :  { %349 = vst.msk [vmem:[#allocation10 + $0x18] sm:$0xff] %vm92_vm0, %v1006_v18  ;;  %v337_v19 = vpop.f32.mrb[3].mxu1 }
 0x205   :  { %348 = vst.msk [vmem:[#allocation10 + $0x10] sm:$0xff] %vm92_vm0, %v337_v19  ;;  %1010 = vmatmul.mubr.msk.f32.vlgmr.msra.gmra.mrb[4].mxu0 %vm352_vm1, %v337_v19 }
 0x206   :  { %1019 = vmatprep.mubr.msk.f32.mxu0 %vm1238_vm2, %v1237_v20 }
 0x2d8   :  { %v1011_v22 = vpop.f32.mrb[4].mxu0 }
 0x2d9   :  { %v425_v23 = vpop.f32.mrb[5].mxu0  ;;  %1018 = vmatpush3.msra.mxu0 %v1011_v22 }
 0x2da   :  { %1013 = vmatpush3.msra.mxu1 %v425_v23  ;;  %1020 = vmatmul.mubr.msk.f32.vlgmr.msra.gmra.mrb[6].mxu0 %vm352_vm1, %v351_v21 }
 0x2db   :  { %1015 = vmatmul.mubr.msk.f32.vlgmr.msra.gmra.mrb[4].mxu1 %vm352_vm1, %v351_v21  ;;  %1027 = vmatprep.subr.mxu0 %v1237_v20 }
 0x2dc   :  { %1022 = vmatprep.subr.mxu1 %v1237_v20  ;;  %1029 = vmatprep.mubr.msk.f32.mxu0 %vm1238_vm2, %v1237_v20 }
 0x2dd   :  { %1024 = vmatprep.mubr.msk.f32.mxu1 %vm1238_vm2, %v1237_v20  ;;  %1028 = vmatpush3.msk.msra.mxu0 %vm585_vm3, %v579_v24 }
 0x2de   :  { %1023 = vmatpush3.msk.msra.mxu1 %vm585_vm3, %v579_v24  ;;  %1037 = vmatprep.subr.mxu0 %v1237_v20 }
 0x2df   :  { %1032 = vmatprep.subr.mxu1 %v1237_v20 }
 0x3ad   :  { %v573_v25 = vpop.f32.mrb[6].mxu0 }
 0x3ae   :  { %578 = vst.msk [vmem:[#allocation11 + $0x8] sm:$0xff] %vm352_vm1, %v573_v25  ;;  %v503_v26 = vpop.f32.mrb[4].mxu1  ;;  %v1021_v27 = vpop.f32.mrb[7].mxu0  ;;  %1030 = vmatmul.mubr.msk.f32.vlgmr.msra.gmra.mrb[8].mxu0 %vm581_vm4, %v573_v25 }
 0x3af   :  { %577 = vst.msk [vmem:[#allocation11] sm:$0xff] %vm352_vm1, %v503_v26  ;;  %v1016_v28 = vpop.f32.mrb[5].mxu1  ;;  %1025 = vmatmul.mubr.msk.f32.vlgmr.msra.gmra.mrb[6].mxu1 %vm581_vm4, %v503_v26  ;;  %1039 = vmatprep.mubr.msk.f32.mxu0 %vm1238_vm2, %v1237_v20 }
 0x3b0   :  { %1034 = vmatprep.mubr.msk.f32.mxu1 %vm1238_vm2, %v1237_v20 }
 0x481   :  { %v728_v30 = vpop.f32.mrb[8].mxu0 }
 0x482   :  { %v655_v31 = vpop.f32.mrb[6].mxu1  ;;  %v1031_v32 = vpop.f32.mrb[9].mxu0  ;;  %1038 = vmatpush3.msk.msra.mxu0 %vm585_vm3, %v728_v30 }
 0x483   :  { %v1026_v33 = vpop.f32.mrb[7].mxu1  ;;  %1033 = vmatpush3.msk.msra.mxu1 %vm585_vm3, %v655_v31  ;;  %1040 = vmatmul.mubr.msk.f32.vlgmr.msra.gmra.mrb[10].mxu0 %vm581_vm4, %v580_v29 }
 0x484   :  { %1035 = vmatmul.mubr.msk.f32.vlgmr.msra.gmra.mrb[8].mxu1 %vm581_vm4, %v580_v29 }
 0x485   :  { %1166 = shalt.err (!%p1163_p8)
}
 0x486   :  { %s1167_s0 = scalar_lea.hbm %s1456_s8, 256 }
 0x487   :  { %p1168_p9 = scmp.ne.s32.totalorder %s1456_s8, %s1167_s0  ;;  %p1171_p10 = scmp.lt.u32.totalorder %s1167_s0, %s1456_s8 }
 0x489   :  { %p1173_p11 = pnand %p1171_p10, %p1168_p9 }
 0x48b   :  { %1176 = shalt.err (!%p1173_p11)
}
 0x48c   :  { %907 = dma.vmem_to_hbm [thread:$0]  %s902_s20, 256, %s1456_s8, [#allocation12], %s1233_s21, %s1233_s21, %s1234_s22  }
 0x48d   :  { %s1177_s13 = scalar_lea.vmem %s890_s24, 512  ;;  %p1182_p13 = scmp.lt.s32.totalorder %s890_s24, %s890_s24 }
 0x48e   :  { %p1178_p12 = scmp.ne.s32.totalorder %s890_s24, %s1177_s13  ;;  %p1183_p0 = scmp.lt.s32.totalorder %s1177_s13, %s1177_s13 }
 0x490   :  { %p1184_p1 = por %p1183_p0, %p1182_p13 }
 0x492   :  { %p1185_p2 = pnand %p1184_p1, %p1178_p12 }
 0x494   :  { %1188 = shalt.err (!%p1185_p2)
}
 0x495   :  { %s1189_s14 = scalar_lea.hbm %s1455_s7, 512 }
 0x496   :  { %p1190_p3 = scmp.ne.s32.totalorder %s1455_s7, %s1189_s14  ;;  %p1193_p4 = scmp.lt.u32.totalorder %s1189_s14, %s1455_s7 }
 0x498   :  { %p1195_p5 = pnand %p1193_p4, %p1190_p3 }
 0x49a   :  { %1198 = shalt.err (!%p1195_p5)
}
 0x49b   :  { %895 = dma.vmem_to_hbm [thread:$0]  %s890_s24, 512, %s1455_s7, [#allocation4], %s1233_s21, %s1233_s21, %s1234_s22   ;;  %vm881_vm5 = vcmask 27648  }
 0x49c   :  { %s1241_s17 = smov [#allocation13]  }
 0x49d   :  { %s913_s6 = sshll.u32 %s1241_s17, 4  ;;  %s914_s6 = int_to_ptr.vmem [resolvable:$true] %s913_s6 }
 0x49e   :  { %s1199_s18 = scalar_lea.vmem %s914_s6, 128  ;;  %p1204_p7 = scmp.lt.s32.totalorder %s914_s6, %s914_s6 }
 0x49f   :  { %p1200_p6 = scmp.ne.s32.totalorder %s914_s6, %s1199_s18  ;;  %p1205_p8 = scmp.lt.s32.totalorder %s1199_s18, %s1199_s18 }
 0x4a1   :  { %p1206_p9 = por %p1205_p8, %p1204_p7 }
 0x4a3   :  { %p1207_p10 = pnand %p1206_p9, %p1200_p6 }
 0x556   :  { %v877_v34 = vpop.f32.mrb[10].mxu0 }
 0x557   :  { %v804_v35 = vpop.f32.mrb[8].mxu1  ;;  %883 = vst.msk [vmem:[#allocation13 + $0x4] sm:$0xf] %vm881_vm5, %v877_v34  ;;  %v1041_v36 = vpop.f32.mrb[11].mxu0 }
 0x558   :  { %882 = vst.msk [vmem:[#allocation13] sm:$0xf] %vm881_vm5, %v804_v35  ;;  %v1036_v37 = vpop.f32.mrb[9].mxu1 }
 0x559   :  { %1210 = shalt.err (!%p1207_p10)
}
 0x55a   :  { %s1211_s7 = scalar_lea.hbm %s1457_s9, 128 }
 0x55b   :  { %p1212_p11 = scmp.ne.s32.totalorder %s1457_s9, %s1211_s7  ;;  %p1215_p12 = scmp.lt.u32.totalorder %s1211_s7, %s1457_s9 }
 0x55d   :  { %p1217_p13 = pnand %p1215_p12, %p1212_p11 }
 0x55f   :  { %1220 = shalt.err (!%p1217_p13)
}
 0x560   :  { %s1242_s25 = smov 64   ;;  %s1243_s3 = smov 4  }
 0x561   :  { %919 = dma.vmem_to_hbm [thread:$0]  %s914_s6, 128, %s1457_s9, [#allocation12], %s1242_s25, %s1242_s25, %s1243_s3  }
 0x562   :  { %1227 = dma.done.wait [#allocation4], 512  }
 0x563   :  { %1228 = vsyncadd [#allocation4], 4294966784 }
 0x564   :  { %1229 = dma.done.wait [#allocation12], 384  }
 0x565   :  { %1230 = vsyncadd [#allocation12], 4294966912 }
 0x566   :  { %929 = vsyncpa [#allocation3], 1 }
 0x567   :  { %930 = vsyncpa [#allocation6], 1 }
 0x568   :  { %931 = vsyncpa [#allocation9], 1 }
 0x569   :  { %932 = vsyncpa [#allocation4], 1 }
 0x56a   :  { %933 = vsyncpa [#allocation12], 1 }

</bundles_post_ra>
